<compile_context>
chip_gen: v7x
topology: tpu7x:2x2x1
jax: 0.10.0
libtpu: 0.0.40
codegen_flags: <defaults>
</compile_context>

<pallas_src>
import functools

import jax
import jax.numpy as jnp
from jax import lax
from jax.experimental import pallas as pl
from jax.experimental.pallas import tpu as pltpu

_LANE = 128
_SUBLANE = 8
_TARGET_BLOCK_BYTES = 8 * 1024 * 1024   # per input block (Pallas double-buffers it)
_MAX_LANE_CHUNKS = 128                  # caps L tile at 16384 -> short unrolled reduce


def _round_up(x, m):
    return ((x + m - 1) // m) * m


def _neutral_for(dtype):
    if jnp.issubdtype(dtype, jnp.floating):
        return float("-inf")            # exact F.max_pool1d parity (not finfo.min)
    return int(jnp.iinfo(dtype).min)


def _full_l_kernel(x_ref, o_ref):
    """One block covers all of L: direct per-row reduce, no accumulator needed."""
    o_ref[...] = jnp.max(x_ref[...], axis=-1, keepdims=True)


def _tiled_kernel(x_ref, o_ref, acc_ref, *, n_chunks, last_chunks, last_rem, neutral):
    """L is tiled: lane-dense (r_tile, 128) running max kept in VMEM scratch."""
    l = pl.program_id(1)
    n_l = pl.num_programs(1)
    is_last = l == n_l - 1

    @pl.when(l == 0)
    def _():
        acc_ref[...] = jnp.full_like(acc_ref, neutral)

    def lane_max(acc, chunks, rem):
        # Element-wise (VPU) maxima over 128-lane chunks; short static loop.
        for c in range(chunks):
            acc = jnp.maximum(acc, x_ref[:, c * _LANE:(c + 1) * _LANE])
        if rem:
            c = chunks
            chunk = x_ref[:, c * _LANE:(c + 1) * _LANE]
            lane = lax.broadcasted_iota(jnp.int32, chunk.shape, 1)
            chunk = jnp.where(lane < rem, chunk, jnp.asarray(neutral, chunk.dtype))
            acc = jnp.maximum(acc, chunk)
        return acc

    tail_differs = (last_chunks != n_chunks) or (last_rem != 0)
    if tail_differs:
        # Tail handling is gated to the final L step only; interior steps are plain.
        @pl.when(jnp.logical_not(is_last))
        def _():
            acc_ref[...] = lane_max(acc_ref[...], n_chunks, 0)

        @pl.when(is_last)
        def _():
            acc_ref[...] = lane_max(acc_ref[...], last_chunks, last_rem)
    else:
        acc_ref[...] = lane_max(acc_ref[...], n_chunks, 0)

    @pl.when(is_last)
    def _():
        # Single XLU cross-lane reduce + single (r_tile, 1) store per row tile.
        o_ref[...] = jnp.max(acc_ref[...], axis=-1, keepdims=True)


def _select_tiles(R, L, itemsize, target_bytes):
    min_r = R if R < _SUBLANE else _SUBLANE
    if R <= _SUBLANE:
        r_cap = R
    else:
        # Guarantee >= 2 row tiles so both v7x TensorCores stream.
        r_cap = max(_SUBLANE, _round_up(-(-R // 2), _SUBLANE))

    row_bytes = L * itemsize
    if min_r * row_bytes <= target_bytes:
        # Whole-L blocks: fully contiguous DMA, no reduction axis.
        r_tile = (target_bytes // row_bytes) // _SUBLANE * _SUBLANE
        r_tile = max(min_r, min(r_cap, r_tile))
        return r_tile, L

    # Tile L: prefer a long (HBM-contiguous) L tile; shrink rows first.
    lt_cap = _MAX_LANE_CHUNKS * _LANE
    r_tile = (target_bytes // (lt_cap * itemsize)) // _SUBLANE * _SUBLANE
    r_tile = max(min_r, min(r_cap, r_tile))
    lt = (target_bytes // (r_tile * itemsize)) // _LANE * _LANE
    lt = max(_LANE, min(lt_cap, lt))
    return r_tile, lt


def global_max_pool1d(x: jax.Array, *, target_block_bytes: int = _TARGET_BLOCK_BYTES):
    """x: (B, C, L) -> (B, C, 1), max over L (matches F.max_pool1d(x, L))."""
    B, C, L = x.shape
    R = B * C
    x2 = x.reshape(R, L)                # free: L is already the contiguous last dim
    itemsize = jnp.dtype(x.dtype).itemsize

    r_tile, lt = _select_tiles(R, L, itemsize, target_block_bytes)
    num_r = pl.cdiv(R, r_tile)
    num_l = pl.cdiv(L, lt)

    block_bytes = r_tile * lt * itemsize
    vmem_limit = int(min(48 * 1024 * 1024,
                         max(16 * 1024 * 1024, 2 * block_bytes + 4 * 1024 * 1024)))
    cost = pl.CostEstimate(flops=R * L, transcendentals=0,
                           bytes_accessed=R * L * itemsize + R * itemsize)

    if num_l == 1:
        out2 = pl.pallas_call(
            _full_l_kernel,
            out_shape=jax.ShapeDtypeStruct((R, 1), x.dtype),
            grid_spec=pltpu.PrefetchScalarGridSpec(
                num_scalar_prefetch=0,
                grid=(num_r,),
                in_specs=[pl.BlockSpec((r_tile, L), lambda r: (r, 0))],
                out_specs=pl.BlockSpec((r_tile, 1), lambda r: (r, 0)),
            ),
            compiler_params=pltpu.CompilerParams(
                dimension_semantics=("parallel",),
                vmem_limit_bytes=vmem_limit,
            ),
            cost_estimate=cost,
        )(x2)
        return out2.reshape(B, C, 1)

    # L-tiled reduction path (very long L only).
    neutral = _neutral_for(x.dtype)
    n_chunks = lt // _LANE
    last_valid = L - (num_l - 1) * lt          # number of valid columns in last L tile
    last_chunks = last_valid // _LANE
    last_rem = last_valid % _LANE

    kernel = functools.partial(
        _tiled_kernel, n_chunks=n_chunks, last_chunks=last_chunks,
        last_rem=last_rem, neutral=neutral)

    out2 = pl.pallas_call(
        kernel,
        out_shape=jax.ShapeDtypeStruct((R, 1), x.dtype),
        grid_spec=pltpu.PrefetchScalarGridSpec(
            num_scalar_prefetch=0,
            grid=(num_r, num_l),                                   # reduction axis last
            in_specs=[pl.BlockSpec((r_tile, lt), lambda r, l: (r, l))],
            out_specs=pl.BlockSpec((r_tile, 1), lambda r, l: (r, 0)),  # resident over L
            scratch_shapes=[pltpu.VMEM((r_tile, _LANE), x.dtype)],
        ),
        compiler_params=pltpu.CompilerParams(
            dimension_semantics=("parallel", "arbitrary"),
            vmem_limit_bytes=vmem_limit,
        ),
        cost_estimate=cost,
    )(x2)
    return out2.reshape(B, C, 1)


if __name__ == "__main__":
    # Shape consistent with the module's forward: (batch, channels, length).
    B, C, L = 2, 4, 16
    x = jax.random.normal(jax.random.PRNGKey(0), (B, C, L), dtype=jnp.float32)
    out = global_max_pool1d(x)
    jax.block_until_ready(out)
    ref = jnp.max(x, axis=2, keepdims=True)
    assert out.shape == (B, C, 1), out.shape
    assert jnp.array_equal(out, ref), "mismatch (full-L path)"

    # Row tiling (num_r = 2, padded last row tile) on the full-L path.
    x2 = jax.random.normal(jax.random.PRNGKey(1), (3, 5, 200), dtype=jnp.float32)
    out2 = global_max_pool1d(x2)
    jax.block_until_ready(out2)
    assert jnp.array_equal(out2, jnp.max(x2, axis=2, keepdims=True)), "mismatch (row-tiled)"

    # Force the L-tiled path with a ragged tail (masked final chunk).
    out3 = global_max_pool1d(x2, target_block_bytes=4096)
    jax.block_until_ready(out3)
    assert jnp.array_equal(out3, jnp.max(x2, axis=2, keepdims=True)), \
        "mismatch (L-tiled, masked tail)"

    # L-tiled path where L is an exact multiple of the L tile (no masking).
    x4 = jax.random.normal(jax.random.PRNGKey(2), (2, 4, 512), dtype=jnp.float32)
    out4 = global_max_pool1d(x4, target_block_bytes=4096)
    jax.block_until_ready(out4)
    assert jnp.array_equal(out4, jnp.max(x4, axis=2, keepdims=True)), \
        "mismatch (L-tiled, exact)"

    print("KERNEL_OK")
</pallas_src>

<mosaic_0001>
module attributes {stable_mosaic.version = 11 : i64} {
  func.func @_full_l_kernel(%arg0: i32, %arg1: memref<8x16xf32, #tpu.memory_space<vmem>>, %arg2: memref<8x1xf32, #tpu.memory_space<vmem>>) attributes {dimension_semantics = [#tpu.dimension_semantics<parallel>], iteration_bounds = array<i64: 1>, scalar_prefetch = 0 : i64, scratch_operands = 0 : i64, tpu.core_type = #tpu.core_type<tc>, window_params = [{transform_indices = @transform_0, window_bounds = array<i64: 8, 16>}, {transform_indices = @transform_1, window_bounds = array<i64: 8, 1>}]} {
    %c0 = arith.constant 0 : index
    %c0_0 = arith.constant 0 : index
    %0 = vector.load %arg1[%c0, %c0_0] : memref<8x16xf32, #tpu.memory_space<vmem>>, vector<8x16xf32>
    %cst = arith.constant dense<0xFF800000> : vector<8xf32>
    %1 = vector.multi_reduction <maximumf>, %0, %cst [1] : vector<8x16xf32> to vector<8xf32>
    %2 = vector.shape_cast %1 : vector<8xf32> to vector<8x1xf32>
    %c0_1 = arith.constant 0 : index
    %c0_2 = arith.constant 0 : index
    %3 = vector.load %arg2[%c0_1, %c0_2] : memref<8x1xf32, #tpu.memory_space<vmem>>, vector<8x1xf32>
    tpu.vector_store %arg2[%c0_1, %c0_2], %2 {strides = array<i32>} : memref<8x1xf32, #tpu.memory_space<vmem>>, vector<8x1xf32>,
    return
  }
  func.func @transform_0(%arg0: i32) -> (i32, i32) {
    %c0_i32 = arith.constant 0 : i32
    %c0_i32_0 = arith.constant 0 : i32
    return %arg0, %c0_i32 : i32, i32
  }
  func.func @transform_1(%arg0: i32) -> (i32, i32) {
    %c0_i32 = arith.constant 0 : i32
    %c0_i32_0 = arith.constant 0 : i32
    return %arg0, %c0_i32 : i32, i32
  }
}

</mosaic_0001>

<bundles_post_ra>
// kernel: tpu_custom_call.1
= control target key start
LH: loop header
LB: loop body
LE: loop exit
PB: predicated region body
PF: predicated region fallthrough
CT: control target
= control target key end

     0   :  { %6 = vsyncpa [#allocation3], 0  ;;  %s57_s6 = smov [#allocation2]   ;;  %s83_s0 = inlined_call_operand.hbm [shape: f32[8,16], index: 0, kind: input, shape index: {}]   ;;  %s84_s1 = inlined_call_operand.vmem [shape: f32[8,1], index: 1, kind: output, shape index: {}]  }
   0x1   :  { %s13_s7 = sshll.u32 %s57_s6, 4  ;;  %s33_s10 = scalar_lea.hbm %s83_s0, 128  ;;  %s14_s7 = int_to_ptr.vmem [resolvable:$true] %s13_s7 }
   0x2   :  { %p34_p0 = scmp.ne.s32.totalorder %s83_s0, %s33_s10  ;;  %p37_p1 = scmp.lt.u32.totalorder %s33_s10, %s83_s0 }
   0x4   :  { %p39_p2 = pnand %p37_p1, %p34_p0 }
   0x6   :  { %42 = shalt.err (!%p39_p2)
}
   0x7   :  { %s43_s15 = scalar_lea.vmem %s14_s7, 128  ;;  %p48_p4 = scmp.lt.s32.totalorder %s14_s7, %s14_s7 }
   0x8   :  { %p44_p3 = scmp.ne.s32.totalorder %s14_s7, %s43_s15  ;;  %p49_p5 = scmp.lt.s32.totalorder %s43_s15, %s43_s15 }
   0xa   :  { %p50_p6 = por %p49_p5, %p48_p4 }
   0xc   :  { %p51_p7 = pnand %p50_p6, %p44_p3 }
   0xe   :  { %54 = shalt.err (!%p51_p7)
}
   0xf   :  { %16 = dma.hbm_to_vmem [thread:$0]  %s83_s0, 128, %s14_s7, [#allocation3]  }
  0x10   :  { %55 = dma.done.wait [#allocation3], 128  }
  0x11   :  { %56 = vsyncadd [#allocation3], 4294967168  ;;  %vm21_vm0 = vcmask 130048   ;;  %v20_v0 = vld [vmem:[#allocation2] sm:$0xff]  ;;  %vm25_vm1 = vcmask 7168  }
  0x12   :  { %v22_v1 = vsel %vm21_vm0, %v20_v0, -inf }
  0x13   :  { %23 = vmax.xlane.f32.xlu0 %v22_v1 }
  0xa0   :  { %v24_v2 = vpop.xlane.xlu0 %23 }
  0xa1   :  { %26 = vst.msk [vmem:[%s84_s1] sm:$0xff] %vm25_vm1, %v24_v2 }
  0xa2   :  { %31 = vsyncpa [#allocation3], 1 }

</bundles_post_ra>
